<compile_context>
chip_gen: v7x
topology: tpu7x:2x2x1
jax: 0.10.0
libtpu: 0.0.40
codegen_flags: <defaults>
</compile_context>

<pallas_src>
import functools

import jax
import jax.numpy as jnp
from jax.experimental import pallas as pl
from jax.experimental.pallas import tpu as pltpu


_LOG_EPS = -13.815510557964274   # log(1e-6): torch's .clamp(min=1e-6) in log space


# ----------------------------- glue (plain JAX) -----------------------------

def _centers_int(boxes, H, W):
    # boxes: (..., 4) normalized [x0, y0, x1, y1]
    scale = jnp.array([W, H], jnp.float32)
    c = (boxes[..., :2] + (boxes[..., 2:] - boxes[..., :2]) / 2.0) * scale
    cx = jnp.clip(c[..., 0], 0, W - 1).astype(jnp.int32)
    cy = jnp.clip(c[..., 1], 0, H - 1).astype(jnp.int32)
    return jnp.stack([cx, cy], axis=-1)  # (..., 2) = (cx, cy)


def _build_heatmap(boxes, H, W):
    # boxes: (N, 4) normalized. Reproduces draw_gaussian2 windowed gaussians
    # (max-composited), vectorized over boxes. The integer box center always gets
    # an exact 1.0 (exp(-0.0)), matching the torch reference's positive set.
    scale = jnp.array([W, H], jnp.float32)
    centers = (boxes[:, :2] + (boxes[:, 2:] - boxes[:, :2]) / 2.0) * scale
    sizes = (boxes[:, 2:] - boxes[:, :2]) * scale
    cx = jnp.clip(centers[:, 0], 0, W - 1).astype(jnp.int32)
    cy = jnp.clip(centers[:, 1], 0, H - 1).astype(jnp.int32)
    sigma = jnp.maximum(1.0, 0.15 * (sizes[:, 0] + sizes[:, 1]) / 2.0)
    tmp = (3.0 * sigma).astype(jnp.int32)  # int(3*sigma); sigma > 0 so trunc == floor
    x0 = jnp.maximum(cx - tmp, 0)
    x1 = jnp.minimum(cx + tmp + 1, W)
    y0 = jnp.maximum(cy - tmp, 0)
    y1 = jnp.minimum(cy + tmp + 1, H)

    xs = jnp.arange(W, dtype=jnp.float32)[None, None, :]
    ys = jnp.arange(H, dtype=jnp.float32)[None, :, None]
    fx = cx.astype(jnp.float32)[:, None, None]
    fy = cy.astype(jnp.float32)[:, None, None]
    g = jnp.exp(-((xs - fx) ** 2 + (ys - fy) ** 2) /
                (2.0 * sigma[:, None, None] ** 2))

    xi = jnp.arange(W)[None, None, :]
    yi = jnp.arange(H)[None, :, None]
    mask = ((xi >= x0[:, None, None]) & (xi < x1[:, None, None]) &
            (yi >= y0[:, None, None]) & (yi < y1[:, None, None]))
    g = jnp.where(mask, g, 0.0)
    return jnp.max(g, axis=0)  # (H, W); background 0, gaussians in [0, 1]


def _round_up(x, m):
    return ((x + m - 1) // m) * m


def _is_v7x():
    try:
        return "v7" in jax.devices()[0].device_kind.lower()
    except Exception:
        return False


# ------------------------------ Pallas kernel -------------------------------

def _focal_loss_kernel(logits_ref, one_m_gt_ref, out_ref, *, n_valid_rows):
    c = pl.program_id(0)
    s = pl.program_id(1)

    @pl.when(s == 0)
    def _():
        out_ref[...] = jnp.zeros_like(out_ref)

    x = logits_ref[...].astype(jnp.float32)            # (TB, HW)
    one_m_gt = one_m_gt_ref[...].astype(jnp.float32)   # (TB, HW) = 1 - gt

    # 2 EUP pushes / element: sigmoid via one tanh, one log; log(1 - sigmoid(x))
    # via the VPU-only identity log(1 - sigmoid(x)) = log(sigmoid(x)) - x.
    pred = 0.5 * (1.0 + jnp.tanh(0.5 * x))             # sigmoid(x)
    log_p_raw = jnp.log(pred)                          # -inf only if pred underflows
    log_p = jnp.maximum(log_p_raw, _LOG_EPS)           # log(clamp(pred, 1e-6))
    log_1mp = jnp.maximum(log_p_raw - x, _LOG_EPS)     # log(clamp(1 - pred, 1e-6))

    pos = (one_m_gt == 0.0).astype(jnp.float32)        # gt == 1
    neg = 1.0 - pos                                    # gt < 1 (gt <= 1 always)
    one_m_pred = 1.0 - pred
    gt4 = (one_m_gt * one_m_gt) * (one_m_gt * one_m_gt)   # (1 - gt)^4
    pos_loss = -(one_m_pred * one_m_pred) * pos * log_p
    neg_loss = -gt4 * (pred * pred) * neg * log_1mp

    # Per-sample normalization (one row == one sample), then sum the rows.
    hw = jnp.float32(x.shape[-1])
    num_pos = jnp.sum(pos, axis=-1, keepdims=True)     # (TB, 1)
    num_neg = jnp.maximum(hw - num_pos, 1.0)
    num_pos = jnp.maximum(num_pos, 1.0)
    row_cls = (jnp.sum(pos_loss, axis=-1, keepdims=True) / num_pos
               + jnp.sum(neg_loss, axis=-1, keepdims=True) / num_neg)

    if n_valid_rows is not None:
        # Ragged tail: rows past the true batch (including whole logically-OOB
        # blocks, whose loaded contents are undefined) contribute exactly zero.
        tb = row_cls.shape[0]
        row0 = (c * pl.num_programs(1) + s) * tb
        row_ids = row0 + jax.lax.broadcasted_iota(jnp.int32, row_cls.shape, 0)
        row_cls = jnp.where(row_ids < n_valid_rows, row_cls, 0.0)

    out_ref[...] += jnp.sum(row_cls)


# --------------------------------- wrapper ----------------------------------

@jax.jit
def detection_loss(pred_logits, pred_boxes, tgt_boxes):
    """pred_logits: (B, 1, H, W); pred_boxes: (B, 2, H, W); tgt_boxes: (B, N, 4)."""
    B, _, H, W = pred_logits.shape
    HW = H * W

    # ---- target rasterization (data-dependent windows; plain-JAX glue) ------
    # TODO(synk): fuse the gaussian rasterization into the kernel (scalar-prefetched
    # per-box (cx, cy, sigma, window) + in-kernel iota/exp) to drop this whole input
    # stream; kept in JAX here to preserve the max-composited window semantics.
    heat = jax.vmap(lambda b: _build_heatmap(b, H, W))(tgt_boxes)     # (B, H, W) f32
    # Ship (1 - heat): positives are exactly (1 - gt) == 0 and (1 - gt)^4 keeps
    # full relative precision near the peak; no below-one clamp needed for bf16.
    one_m_heat2d = (1.0 - heat).reshape(B, HW).astype(jnp.bfloat16)
    logits2d = pred_logits[:, 0].reshape(B, HW).astype(jnp.bfloat16)

    # ---- tiling: TB samples per grid step; core split only on v7x -----------
    is_v7x = _is_v7x()
    ncores = 2 if is_v7x else 1

    target_tile_bytes = 4 * 1024 * 1024                 # per bf16 input tile
    bytes_per_row = HW * 2
    tb_from_bytes = max(16, (target_tile_bytes // bytes_per_row) // 16 * 16)
    tb_from_batch = _round_up(pl.cdiv(B, ncores), 16)
    TB = min(tb_from_bytes, tb_from_batch)

    total_blocks = pl.cdiv(B, TB)
    if total_blocks < ncores:                            # nothing to split
        ncores = 1
    lead_sem = pltpu.CORE_PARALLEL if (is_v7x and ncores == 2) else pltpu.ARBITRARY
    steps = pl.cdiv(total_blocks, ncores)
    needs_mask = (ncores * steps * TB) != B

    kernel = functools.partial(_focal_loss_kernel,
                               n_valid_rows=B if needs_mask else None)

    def _in_map(c, s):
        # Clamp so a logically-OOB block re-reads the last valid block; the kernel
        # masks its rows out via the (unclamped) row-id test.
        return (jnp.minimum(c * steps + s, total_blocks - 1), 0)

    cls_partials = pl.pallas_call(
        kernel,
        out_shape=jax.ShapeDtypeStruct((ncores, 1, 1), jnp.float32),
        grid_spec=pltpu.PrefetchScalarGridSpec(
            num_scalar_prefetch=0,
            grid=(ncores, steps),
            in_specs=[
                pl.BlockSpec((TB, HW), _in_map),
                pl.BlockSpec((TB, HW), _in_map),
            ],
            out_specs=pl.BlockSpec((1, 1, 1), lambda c, s: (c, 0, 0)),
        ),
        compiler_params=pltpu.CompilerParams(
            dimension_semantics=(lead_sem, pltpu.ARBITRARY),
            vmem_limit_bytes=32 * 1024 * 1024),
    )(logits2d, one_m_heat2d)
    total_cls = jnp.sum(cls_partials) / B

    # ---- L1 box loss (B*N*2 values; negligible — plain JAX, f32) ------------
    # TODO(synk): ragged / empty per-sample target lists (valid_box_batches) are
    # not modeled; every sample here has N > 0 boxes so valid_box_batches == B.
    centers = _centers_int(tgt_boxes, H, W)                            # (B, N, 2)

    def gather(pb, ctr):                  # pb: (2, H, W), ctr: (N, 2) = (cx, cy)
        return pb[:, ctr[:, 1], ctr[:, 0]].T                           # (N, 2)

    pbox = jax.vmap(gather)(pred_boxes, centers)                       # (B, N, 2)
    tsize = tgt_boxes[..., 2:] - tgt_boxes[..., :2]                    # (B, N, 2)
    avg_box = jnp.mean(jnp.mean(jnp.abs(pbox - tsize), axis=(1, 2)))
    return total_cls, avg_box


# ------------------------------ reference ----------------------------------

def _reference(pred_logits, pred_boxes, tgt_boxes):
    B, _, H, W = pred_logits.shape
    total_cls = 0.0
    total_box = 0.0
    for i in range(B):
        gt = _build_heatmap(tgt_boxes[i], H, W)
        pred = 1.0 / (1.0 + jnp.exp(-pred_logits[i, 0].astype(jnp.float32)))
        pos = (gt == 1.0).astype(jnp.float32)
        neg = (gt < 1.0).astype(jnp.float32)
        p_l = -((1.0 - pred) ** 2) * pos * jnp.log(jnp.maximum(pred, 1e-6))
        n_l = -((1.0 - gt) ** 4) * (pred ** 2) * neg * \
            jnp.log(jnp.maximum(1.0 - pred, 1e-6))
        total_cls += (jnp.sum(p_l) / jnp.maximum(jnp.sum(pos), 1.0) +
                      jnp.sum(n_l) / jnp.maximum(jnp.sum(neg), 1.0))
        ctr = _centers_int(tgt_boxes[i], H, W)
        pb = pred_boxes[i][:, ctr[:, 1], ctr[:, 0]].T
        total_box += jnp.mean(jnp.abs(
            pb - (tgt_boxes[i, :, 2:] - tgt_boxes[i, :, :2])))
    return total_cls / B, total_box / B


# --------------------------------- main -------------------------------------

if __name__ == "__main__":
    key = jax.random.PRNGKey(0)
    B, H, W, N = 2, 16, 16, 3
    k1, k2, k3, k4 = jax.random.split(key, 4)

    pred_logits = jax.random.normal(k1, (B, 1, H, W), jnp.float32)
    pred_boxes = jax.random.uniform(k2, (B, 2, H, W), jnp.float32)
    xy0 = jax.random.uniform(k3, (B, N, 2), jnp.float32, minval=0.05, maxval=0.55)
    wh = jax.random.uniform(k4, (B, N, 2), jnp.float32, minval=0.10, maxval=0.40)
    tgt_boxes = jnp.concatenate([xy0, xy0 + wh], axis=-1)   # (B, N, 4) normalized

    cls_loss, box_loss = detection_loss(pred_logits, pred_boxes, tgt_boxes)
    jax.block_until_ready((cls_loss, box_loss))

    ref_cls, ref_box = _reference(pred_logits, pred_boxes, tgt_boxes)
    # cls: f32 reference vs kernel fed bf16 inputs (f32 math in-kernel); expect
    # ~0.1-0.5% deviation purely from input quantization.
    assert jnp.allclose(cls_loss, ref_cls, rtol=1e-2, atol=1e-4), (cls_loss, ref_cls)
    assert jnp.allclose(box_loss, ref_box, rtol=1e-4, atol=1e-6), (box_loss, ref_box)

    print("KERNEL_OK")
</pallas_src>

<mosaic_0001>
module attributes {stable_mosaic.version = 11 : i64} {
  func.func @_focal_loss_kernel(%arg0: i32, %arg1: i32, %arg2: memref<16x256xbf16, #tpu.memory_space<vmem>>, %arg3: memref<16x256xbf16, #tpu.memory_space<vmem>>, %arg4: memref<1x1x1xf32, #tpu.memory_space<vmem>>) attributes {dimension_semantics = [#tpu.dimension_semantics<arbitrary>, #tpu.dimension_semantics<arbitrary>], iteration_bounds = array<i64: 1, 1>, scalar_prefetch = 0 : i64, scratch_operands = 0 : i64, tpu.core_type = #tpu.core_type<tc>, window_params = [{transform_indices = @transform_0, window_bounds = array<i64: 16, 256>}, {transform_indices = @transform_1, window_bounds = array<i64: 16, 256>}, {transform_indices = @transform_2, window_bounds = array<i64: 1, 1, 1>}]} {
    %c0_i32 = arith.constant 0 : i32
    %0 = arith.cmpi eq, %arg1, %c0_i32 : i32
    %1 = arith.extui %0 : i1 to i32
    %c0_i32_0 = arith.constant 0 : i32
    %2 = arith.cmpi ne, %1, %c0_i32_0 : i32
    scf.if %2 {
      %cst_27 = arith.constant 0.000000e+00 : f32
      %75 = vector.broadcast %cst_27 : f32 to vector<1x1x1xf32>
      %c0_28 = arith.constant 0 : index
      %c0_29 = arith.constant 0 : index
      %c0_30 = arith.constant 0 : index
      %76 = vector.load %arg4[%c0_28, %c0_29, %c0_30] : memref<1x1x1xf32, #tpu.memory_space<vmem>>, vector<1x1x1xf32>
      tpu.vector_store %arg4[%c0_28, %c0_29, %c0_30], %75 {strides = array<i32>} : memref<1x1x1xf32, #tpu.memory_space<vmem>>, vector<1x1x1xf32>,
    } else {
    }
    %c0 = arith.constant 0 : index
    %c0_1 = arith.constant 0 : index
    %3 = vector.load %arg2[%c0, %c0_1] : memref<16x256xbf16, #tpu.memory_space<vmem>>, vector<16x256xbf16>
    %4 = arith.extf %3 : vector<16x256xbf16> to vector<16x256xf32>
    %c0_2 = arith.constant 0 : index
    %c0_3 = arith.constant 0 : index
    %5 = vector.load %arg3[%c0_2, %c0_3] : memref<16x256xbf16, #tpu.memory_space<vmem>>, vector<16x256xbf16>
    %6 = arith.extf %5 : vector<16x256xbf16> to vector<16x256xf32>
    %cst = arith.constant 5.000000e-01 : f32
    %7 = vector.broadcast %cst : f32 to vector<16x256xf32>
    %8 = arith.mulf %7, %4 : vector<16x256xf32>
    %9 = math.tanh %8 : vector<16x256xf32>
    %cst_4 = arith.constant 1.000000e+00 : f32
    %10 = vector.broadcast %cst_4 : f32 to vector<16x256xf32>
    %11 = arith.addf %10, %9 : vector<16x256xf32>
    %cst_5 = arith.constant 5.000000e-01 : f32
    %12 = vector.broadcast %cst_5 : f32 to vector<16x256xf32>
    %13 = arith.mulf %12, %11 : vector<16x256xf32>
    %14 = math.log %13 : vector<16x256xf32>
    %cst_6 = arith.constant -13.8155107 : f32
    %15 = vector.broadcast %cst_6 : f32 to vector<16x256xf32>
    %16 = arith.maximumf %14, %15 : vector<16x256xf32>
    %17 = arith.subf %14, %4 : vector<16x256xf32>
    %cst_7 = arith.constant -13.8155107 : f32
    %18 = vector.broadcast %cst_7 : f32 to vector<16x256xf32>
    %19 = arith.maximumf %17, %18 : vector<16x256xf32>
    %cst_8 = arith.constant 0.000000e+00 : f32
    %20 = vector.broadcast %cst_8 : f32 to vector<16x256xf32>
    %21 = arith.cmpf oeq, %6, %20 : vector<16x256xf32>
    %22 = arith.extui %21 : vector<16x256xi1> to vector<16x256xi32>
    %23 = arith.sitofp %22 : vector<16x256xi32> to vector<16x256xf32>
    %cst_9 = arith.constant 1.000000e+00 : f32
    %24 = vector.broadcast %cst_9 : f32 to vector<16x256xf32>
    %25 = arith.subf %24, %23 : vector<16x256xf32>
    %cst_10 = arith.constant 1.000000e+00 : f32
    %26 = vector.broadcast %cst_10 : f32 to vector<16x256xf32>
    %27 = arith.subf %26, %13 : vector<16x256xf32>
    %28 = arith.mulf %6, %6 : vector<16x256xf32>
    %29 = arith.mulf %6, %6 : vector<16x256xf32>
    %30 = arith.mulf %28, %29 : vector<16x256xf32>
    %31 = arith.mulf %27, %27 : vector<16x256xf32>
    %cst_11 = arith.constant 0.000000e+00 : f32
    %32 = vector.broadcast %cst_11 : f32 to vector<16x256xf32>
    %33 = arith.subf %32, %31 : vector<16x256xf32>
    %34 = arith.mulf %33, %23 : vector<16x256xf32>
    %35 = arith.mulf %34, %16 : vector<16x256xf32>
    %cst_12 = arith.constant 0.000000e+00 : f32
    %36 = vector.broadcast %cst_12 : f32 to vector<16x256xf32>
    %37 = arith.subf %36, %30 : vector<16x256xf32>
    %38 = arith.mulf %13, %13 : vector<16x256xf32>
    %39 = arith.mulf %37, %38 : vector<16x256xf32>
    %40 = arith.mulf %39, %25 : vector<16x256xf32>
    %41 = arith.mulf %40, %19 : vector<16x256xf32>
    %cst_13 = arith.constant dense<0.000000e+00> : vector<16xf32>
    %42 = vector.multi_reduction <add>, %23, %cst_13 [1] : vector<16x256xf32> to vector<16xf32>
    %43 = vector.shape_cast %42 : vector<16xf32> to vector<16x1xf32>
    %cst_14 = arith.constant 2.560000e+02 : f32
    %44 = vector.broadcast %cst_14 : f32 to vector<16x1xf32>
    %45 = arith.subf %44, %43 : vector<16x1xf32>
    %cst_15 = arith.constant 1.000000e+00 : f32
    %46 = vector.broadcast %cst_15 : f32 to vector<16x1xf32>
    %47 = arith.maximumf %45, %46 : vector<16x1xf32>
    %cst_16 = arith.constant 1.000000e+00 : f32
    %48 = vector.broadcast %cst_16 : f32 to vector<16x1xf32>
    %49 = arith.maximumf %43, %48 : vector<16x1xf32>
    %cst_17 = arith.constant dense<0.000000e+00> : vector<16xf32>
    %50 = vector.multi_reduction <add>, %35, %cst_17 [1] : vector<16x256xf32> to vector<16xf32>
    %51 = vector.shape_cast %50 : vector<16xf32> to vector<16x1xf32>
    %52 = arith.divf %51, %49 : vector<16x1xf32>
    %cst_18 = arith.constant dense<0.000000e+00> : vector<16xf32>
    %53 = vector.multi_reduction <add>, %41, %cst_18 [1] : vector<16x256xf32> to vector<16xf32>
    %54 = vector.shape_cast %53 : vector<16xf32> to vector<16x1xf32>
    %55 = arith.divf %54, %47 : vector<16x1xf32>
    %56 = arith.addf %52, %55 : vector<16x1xf32>
    %c1_i32 = arith.constant 1 : i32
    %57 = arith.muli %arg0, %c1_i32 : i32
    %58 = arith.addi %57, %arg1 : i32
    %c16_i32 = arith.constant 16 : i32
    %59 = arith.muli %58, %c16_i32 : i32
    %60 = tpu.iota {dimensions = array<i32: 0>} : vector<16x1xi32>
    %61 = vector.broadcast %59 : i32 to vector<16x1xi32>
    %62 = arith.addi %61, %60 : vector<16x1xi32>
    %c2_i32 = arith.constant 2 : i32
    %63 = vector.broadcast %c2_i32 : i32 to vector<16x1xi32>
    %64 = arith.cmpi slt, %62, %63 : vector<16x1xi32>
    %cst_19 = arith.constant 0.000000e+00 : f32
    %65 = vector.broadcast %cst_19 : f32 to vector<16x1xf32>
    %66 = arith.select %64, %56, %65 : vector<16x1xi1>, vector<16x1xf32>
    %c0_20 = arith.constant 0 : index
    %c0_21 = arith.constant 0 : index
    %c0_22 = arith.constant 0 : index
    %67 = vector.load %arg4[%c0_20, %c0_21, %c0_22] : memref<1x1x1xf32, #tpu.memory_space<vmem>>, vector<1x1x1xf32>
    %68 = vector.shape_cast %66 : vector<16x1xf32> to vector<1x16x1xf32>
    %cst_23 = arith.constant dense<0.000000e+00> : vector<1xf32>
    %69 = vector.multi_reduction <add>, %68, %cst_23 [1, 2] : vector<1x16x1xf32> to vector<1xf32>
    %70 = vector.shape_cast %69 : vector<1xf32> to vector<1x1x1xf32>
    %71 = vector.extract %70[0, 0, 0] : f32 from vector<1x1x1xf32>
    %72 = vector.broadcast %71 : f32 to vector<1x1x1xf32>
    %73 = arith.addf %67, %72 : vector<1x1x1xf32>
    %c0_24 = arith.constant 0 : index
    %c0_25 = arith.constant 0 : index
    %c0_26 = arith.constant 0 : index
    %74 = vector.load %arg4[%c0_24, %c0_25, %c0_26] : memref<1x1x1xf32, #tpu.memory_space<vmem>>, vector<1x1x1xf32>
    tpu.vector_store %arg4[%c0_24, %c0_25, %c0_26], %73 {strides = array<i32>} : memref<1x1x1xf32, #tpu.memory_space<vmem>>, vector<1x1x1xf32>,
    return
  }
  func.func @transform_0(%arg0: i32, %arg1: i32) -> (i32, i32) {
    %c1_i32 = arith.constant 1 : i32
    %0 = arith.muli %arg0, %c1_i32 : i32
    %1 = arith.addi %0, %arg1 : i32
    %c0_i32 = arith.constant 0 : i32
    %2 = arith.minsi %1, %c0_i32 : i32
    %c0_i32_0 = arith.constant 0 : i32
    %c0_i32_1 = arith.constant 0 : i32
    return %2, %c0_i32_0 : i32, i32
  }
  func.func @transform_1(%arg0: i32, %arg1: i32) -> (i32, i32) {
    %c1_i32 = arith.constant 1 : i32
    %0 = arith.muli %arg0, %c1_i32 : i32
    %1 = arith.addi %0, %arg1 : i32
    %c0_i32 = arith.constant 0 : i32
    %2 = arith.minsi %1, %c0_i32 : i32
    %c0_i32_0 = arith.constant 0 : i32
    %c0_i32_1 = arith.constant 0 : i32
    return %2, %c0_i32_0 : i32, i32
  }
  func.func @transform_2(%arg0: i32, %arg1: i32) -> (i32, i32, i32) {
    %c0_i32 = arith.constant 0 : i32
    %c0_i32_0 = arith.constant 0 : i32
    %c0_i32_1 = arith.constant 0 : i32
    return %arg0, %c0_i32, %c0_i32_0 : i32, i32, i32
  }
}

</mosaic_0001>

<bundles_post_ra>
// kernel: detection_loss.1
= control target key start
LH: loop header
LB: loop body
LE: loop exit
PB: predicated region body
PF: predicated region fallthrough
CT: control target
= control target key end

     0   :  { %s756_s0 = inlined_call_operand.vmem [shape: bf16[2,256], index: 0, kind: input, shape index: {}]   ;;  %s757_s1 = inlined_call_operand.vmem [shape: bf16[2,256], index: 1, kind: input, shape index: {}]   ;;  %s758_s2 = inlined_call_operand.hbm [shape: f32[1,1,1], index: 2, kind: output, shape index: {}]  }
   0x1   :  { %v656_v0 = vld [vmem:[%s756_s0] sm:$0x3]  ;;  %v661_v1 = vld [vmem:[%s756_s0 + $0x2] sm:$0x3]  ;;  %v666_v2 = vld [vmem:[%s756_s0 + $0x4] sm:$0x3] }
   0x2   :  { %v671_v3 = vld [vmem:[%s756_s0 + $0x6] sm:$0x3]  ;;  %v120_v4 = vunpack.c.l.bf16 %v656_v0  ;;  %v121_v5 = vunpack.c.l.bf16 %v661_v1  ;;  %v128_v6 = vld [vmem:[%s757_s1] sm:$0x3]  ;;  %v122_v7 = vunpack.c.l.bf16 %v666_v2  ;;  %v129_v9 = vld [vmem:[%s757_s1 + $0x2] sm:$0x3] }
   0x3   :  { %v123_v8 = vunpack.c.l.bf16 %v671_v3  ;;  %v130_v10 = vld [vmem:[%s757_s1 + $0x4] sm:$0x3]  ;;  %v131_v11 = vld [vmem:[%s757_s1 + $0x6] sm:$0x3]  ;;  %v136_v12 = vunpack.c.l.bf16 %v128_v6  ;;  %v137_v13 = vunpack.c.l.bf16 %v129_v9 }
   0x4   :  { %v138_v14 = vunpack.c.l.bf16 %v130_v10  ;;  %v139_v15 = vunpack.c.l.bf16 %v131_v11  ;;  %v144_v16 = vmul.f32 0.5, %v120_v4 }
   0x5   :  { %7 = vsyncpa [#allocation3], 0  ;;  %v145_v17 = vmul.f32 0.5, %v121_v5  ;;  %v146_v18 = vmul.f32 0.5, %v122_v7  ;;  %v147_v19 = vmul.f32 0.5, %v123_v8  ;;  %vm216_vm0 = vcmp.eq.f32.partialorder %v136_v12, 0.0 }
   0x6   :  { %591 = vtanh.f32 %v144_v16  ;;  %v357_v20 = vlaneseq  ;;  %vm217_vm1 = vcmp.eq.f32.partialorder %v137_v13, 0.0  ;;  %vm218_vm2 = vcmp.eq.f32.partialorder %v138_v14, 0.0  ;;  %s637_s1 = smov [#allocation2]  }
   0x7   :  { %593 = vtanh.f32 %v145_v17  ;;  %vm219_vm3 = vcmp.eq.f32.partialorder %v139_v15, 0.0  ;;  %v635_v21 = vmov 0.0   ;;  %v636_v26 = vmov 1983009808   ;;  %s558_s24 = sshll.u32 %s637_s1, 4  ;;  %s559_s24 = int_to_ptr.vmem [resolvable:$true] %s558_s24 }
   0x8   :  { %595 = vtanh.f32 %v146_v18  ;;  %v698_v22 = vsel %vm216_vm0, 1.0, %v635_v21  ;;  %v701_v23 = vsel %vm217_vm1, 1.0, %v635_v21  ;;  %v704_v24 = vsel %vm218_vm2, 1.0, %v635_v21  ;;  %s611_s26 = scalar_lea.vmem %s559_s24, 16  ;;  %s615_s27 = scalar_lea.vmem %s559_s24, 32 }
   0x9   :  { %597 = vtanh.f32 %v147_v19  ;;  %v707_v25 = vsel %vm219_vm3, 1.0, %v635_v21  ;;  %v355_v27 = vunpack.c.l.s4 %v636_v26  ;;  %v709_v28 = vshrl.u32 %v357_v20, 7  ;;  %p612_p0 = scmp.ne.s32.totalorder %s559_s24, %s611_s26  ;;  %p616_p1 = scmp.lt.s32.totalorder %s559_s24, %s559_s24 }
   0xa   :  { %v256_v29 = vmul.f32 %v136_v12, %v136_v12  ;;  %v257_v30 = vmul.f32 %v137_v13, %v137_v13  ;;  %v352_v31 = vcombine.low %v698_v22, %v701_v23  ;;  %v353_v32 = vcombine.low %v704_v24, %v707_v25  ;;  %p617_p2 = scmp.lt.s32.totalorder %s615_s27, %s611_s26 }
   0xb   :  { %v356_v33 = vunpack.c.0.s8 %v355_v27  ;;  %v258_v34 = vmul.f32 %v138_v14, %v138_v14  ;;  %v259_v35 = vmul.f32 %v139_v15, %v139_v15  ;;  %v241_v17 = vsub.f32 1.0, %v701_v23 }
   0xc   :  { %v264_v40 = vmul.f32 %v256_v29, %v256_v29  ;;  %v265_v43 = vmul.f32 %v257_v30, %v257_v30  ;;  %v240_v26 = vsub.f32 1.0, %v698_v22  ;;  %v242_v29 = vsub.f32 1.0, %v704_v24  ;;  %p618_p3 = por %p617_p2, %p616_p1 }
   0xd   :  { %v716_v37 = vsub.s32 %v356_v33, %v709_v28  ;;  %v266_v49 = vmul.f32 %v258_v34, %v258_v34  ;;  %v267_v50 = vmul.f32 %v259_v35, %v259_v35  ;;  %v243_v33 = vsub.f32 1.0, %v707_v25 }
   0xe   :  { %v304_v57 = vsub.f32 0.0, %v264_v40  ;;  %v305_v62 = vsub.f32 0.0, %v265_v43  ;;  %vm530_vm4 = vcmp.lt.s32.totalorder %v709_v28, 2  ;;  %vm535_vm5 = vcmask 7168   ;;  %p619_p4 = pnand %p618_p3, %p612_p0 }
   0xf   :  { %v360_v44 = vrot.slane %v352_v31, %v716_v37  ;;  %v367_v45 = vrot.slane %v353_v32, %v716_v37  ;;  %v306_v12 = vsub.f32 0.0, %v266_v49  ;;  %v307_v15 = vsub.f32 0.0, %v267_v50 }
  0x10   :  { %v592_v36 = vpop.eup %591  ;;  %vm110_vm6 = vcmask 0  }
  0x11   :  { %v594_v38 = vpop.eup %593  ;;  %v160_v39 = vadd.f32 1.0, %v592_v36  ;;  %v368_v53 = vcombine.low %v360_v44, %v367_v45  ;;  %v369_v54 = vcombine.high %v360_v44, %v367_v45  ;;  %111 = vst.msk [vmem:[#allocation2] sm:$0x1] %vm110_vm6, %v635_v21 }
  0x12   :  { %v596_v41 = vpop.eup %595  ;;  %v161_v42 = vadd.f32 1.0, %v594_v38 }
  0x13   :  { %v598_v46 = vpop.eup %597  ;;  %v162_v47 = vadd.f32 1.0, %v596_v41  ;;  %v168_v48 = vmul.f32 0.5, %v160_v39  ;;  %v392_v60 = vadd.f32 %v369_v54, %v368_v53 }
  0x14   :  { %v163_v51 = vadd.f32 1.0, %v598_v46  ;;  %v169_v52 = vmul.f32 0.5, %v161_v42 }
  0x15   :  { %v170_v55 = vmul.f32 0.5, %v162_v47  ;;  %v248_v56 = vsub.f32 1.0, %v168_v48  ;;  %599 = vlog2.f32 %v168_v48  ;;  %v312_v63 = vmul.f32 %v168_v48, %v168_v48  ;;  %393 = vadd.xlane.f32.xlu0 %v392_v60 }
  0x16   :  { %v171_v58 = vmul.f32 0.5, %v163_v51  ;;  %v249_v59 = vsub.f32 1.0, %v169_v52  ;;  %601 = vlog2.f32 %v169_v52  ;;  %v313_v13 = vmul.f32 %v169_v52, %v169_v52 }
  0x17   :  { %v250_v61 = vsub.f32 1.0, %v170_v55  ;;  %603 = vlog2.f32 %v170_v55  ;;  %v272_v9 = vmul.f32 %v248_v56, %v248_v56  ;;  %v314_v14 = vmul.f32 %v170_v55, %v170_v55 }
  0x18   :  { %v251_v6 = vsub.f32 1.0, %v171_v58  ;;  %v273_v10 = vmul.f32 %v249_v59, %v249_v59  ;;  %605 = vlog2.f32 %v171_v58  ;;  %v315_v16 = vmul.f32 %v171_v58, %v171_v58 }
  0x19   :  { %v274_v11 = vmul.f32 %v250_v61, %v250_v61  ;;  %v280_v19 = vsub.f32 0.0, %v272_v9  ;;  %v320_v27 = vmul.f32 %v312_v63, %v304_v57  ;;  %v321_v31 = vmul.f32 %v313_v13, %v305_v62 }
  0x1a   :  { %v275_v18 = vmul.f32 %v251_v6, %v251_v6  ;;  %v281_v20 = vsub.f32 0.0, %v273_v10  ;;  %v322_v32 = vmul.f32 %v314_v14, %v306_v12  ;;  %v323_v34 = vmul.f32 %v315_v16, %v307_v15 }
  0x1b   :  { %v282_v30 = vsub.f32 0.0, %v274_v11  ;;  %v288_v40 = vmul.f32 %v698_v22, %v280_v19  ;;  %v328_v42 = vmul.f32 %v320_v27, %v240_v26  ;;  %v329_v46 = vmul.f32 %v321_v31, %v241_v17 }
  0x1c   :  { %v283_v36 = vsub.f32 0.0, %v275_v18  ;;  %v289_v39 = vmul.f32 %v701_v23, %v281_v20  ;;  %v330_v47 = vmul.f32 %v322_v32, %v242_v29  ;;  %v331_v52 = vmul.f32 %v323_v34, %v243_v33 }
  0x1d   :  { %v290_v44 = vmul.f32 %v704_v24, %v282_v30 }
  0x1e   :  { %v291_v53 = vmul.f32 %v707_v25, %v283_v36 }
  0x1f   :  { %v600_v35 = vpop.eup %599 }
  0x20   :  { %v602_v38 = vpop.eup %601  ;;  %v177_v41 = vmul.f32 0.6931472, %v600_v35 }
  0x21   :  { %v604_v43 = vpop.eup %603  ;;  %v179_v45 = vmul.f32 0.6931472, %v602_v38 }
  0x22   :  { %v606_v48 = vpop.eup %605  ;;  %v181_v49 = vmul.f32 0.6931472, %v604_v43  ;;  %v192_v50 = vmax.f32 %v177_v41, -13.815511  ;;  %v200_v51 = vsub.f32 %v177_v41, %v120_v4 }
  0x23   :  { %v183_v23 = vmul.f32 0.6931472, %v606_v48  ;;  %v193_v54 = vmax.f32 %v179_v45, -13.815511  ;;  %v201_v22 = vsub.f32 %v179_v45, %v121_v5  ;;  %v534_v45 = vld [vmem:[#allocation2] sm:$0x1] }
  0x24   :  { %v194_v55 = vmax.f32 %v181_v49, -13.815511  ;;  %v296_v56 = vmul.f32 %v288_v40, %v192_v50  ;;  %v202_v24 = vsub.f32 %v181_v49, %v122_v7  ;;  %v208_v57 = vmax.f32 %v200_v51, -13.815511 }
  0x25   :  { %v195_v58 = vmax.f32 %v183_v23, -13.815511  ;;  %v297_v59 = vmul.f32 %v289_v39, %v193_v54  ;;  %v203_v0 = vsub.f32 %v183_v23, %v123_v8  ;;  %v209_v4 = vmax.f32 %v201_v22, -13.815511 }
  0x26   :  { %v298_v60 = vmul.f32 %v290_v44, %v194_v55  ;;  %v210_v61 = vmax.f32 %v202_v24, -13.815511  ;;  %v336_v25 = vmul.f32 %v328_v42, %v208_v57 }
  0x27   :  { %v299_v62 = vmul.f32 %v291_v53, %v195_v58  ;;  %v412_v63 = vcombine.low %v296_v56, %v297_v59  ;;  %v211_v6 = vmax.f32 %v203_v0, -13.815511  ;;  %v337_v1 = vmul.f32 %v329_v46, %v209_v4 }
  0x28   :  { %v338_v5 = vmul.f32 %v330_v47, %v210_v61 }
  0x29   :  { %v413_v9 = vcombine.low %v298_v60, %v299_v62  ;;  %v420_v10 = vrot.slane %v412_v63, %v716_v37  ;;  %v339_v2 = vmul.f32 %v331_v52, %v211_v6  ;;  %v470_v7 = vcombine.low %v336_v25, %v337_v1 }
  0x2b   :  { %v427_v11 = vrot.slane %v413_v9, %v716_v37  ;;  %v471_v12 = vcombine.low %v338_v5, %v339_v2  ;;  %v478_v3 = vrot.slane %v470_v7, %v716_v37 }
  0x2d   :  { %v428_v8 = vcombine.low %v420_v10, %v427_v11  ;;  %v429_v13 = vcombine.high %v420_v10, %v427_v11  ;;  %v485_v14 = vrot.slane %v471_v12, %v716_v37 }
  0x2f   :  { %v452_v15 = vadd.f32 %v429_v13, %v428_v8  ;;  %v486_v16 = vcombine.low %v478_v3, %v485_v14  ;;  %v487_v17 = vcombine.high %v478_v3, %v485_v14 }
  0x31   :  { %453 = vadd.xlane.f32.xlu0 %v452_v15  ;;  %v510_v18 = vadd.f32 %v487_v17, %v486_v16 }
  0x33   :  { %511 = vadd.xlane.f32.xlu1 %v510_v18 }
  0xa2   :  { %v394_v19 = vpop.xlane.xlu0 %393 }
  0xa3   :  { %v398_v20 = vsub.f32 256.0, %v394_v19  ;;  %v402_v26 = vmax.f32 %v394_v19, 1.0 }
  0xa5   :  { %v400_v27 = vmax.f32 %v398_v20, 1.0  ;;  %607 = vrcp.f32 %v402_v26 }
  0xa7   :  { %609 = vrcp.f32 %v400_v27 }
  0xaf   :  { %v608_v29 = vpop.eup %607 }
  0xb1   :  { %v610_v30 = vpop.eup %609 }
  0xbe   :  { %v454_v31 = vpop.xlane.xlu0 %453 }
  0xbf   :  { %v459_v33 = vmul.f32 %v608_v29, %v454_v31 }
  0xc0   :  { %v512_v32 = vpop.xlane.xlu1 %511 }
  0xc1   :  { %v517_v34 = vmul.f32 %v610_v30, %v512_v32 }
  0xc3   :  { %v520_v37 = vadd.f32 %v517_v34, %v459_v33 }
  0xc5   :  { %v532_v35 = vsel %vm530_vm4, %v520_v37, 0.0 }
  0xc6   :  { %v536_v36 = vsel %vm535_vm5, %v532_v35, 0.0 }
  0xc7   :  { %539 = vadd.xlane.f32.xlu1 %v536_v36 }
 0x154   :  { %v540_v38 = vpop.xlane.xlu1 %539 }
 0x155   :  { %v541_v39 = vrot.slane %v540_v38, 4 }
 0x157   :  { %v542_v40 = vadd.f32 %v541_v39, %v540_v38 }
 0x159   :  { %v543_v41 = vrot.slane %v542_v40, 2 }
 0x15b   :  { %v544_v42 = vadd.f32 %v543_v41, %v542_v40 }
 0x15d   :  { %v545_v43 = vrot.slane %v544_v42, 1 }
 0x15f   :  { %v546_v44 = vadd.f32 %v545_v43, %v544_v42 }
 0x161   :  { %586 = vpush %v546_v44 }
 0x192   :  { %s587_s25 = spop %586 }
 0x193   :  { %v548_v28 = vstv %s587_s25 }
 0x194   :  { %v549_v46 = vadd.f32 %v548_v28, %v534_v45 }
 0x196   :  { %551 = vst.msk [vmem:[#allocation2] sm:$0x1] %vm110_vm6, %v549_v46 }
 0x197   :  { %622 = shalt.err (!%p619_p4)
}
 0x198   :  { %s623_s30 = scalar_lea.hbm %s758_s2, 16 }
 0x199   :  { %p624_p5 = scmp.ne.s32.totalorder %s758_s2, %s623_s30  ;;  %p627_p6 = scmp.lt.u32.totalorder %s623_s30, %s758_s2 }
 0x19b   :  { %p629_p7 = pnand %p627_p6, %p624_p5 }
 0x19d   :  { %632 = shalt.err (!%p629_p7)
}
 0x19e   :  { %561 = dma.vmem_to_hbm [thread:$0]  %s559_s24, 16, %s758_s2, [#allocation3]  }
 0x19f   :  { %633 = dma.done.wait [#allocation3], 16  }
 0x1a0   :  { %634 = vsyncadd [#allocation3], 4294967280 }
 0x1a1   :  { %565 = vsyncpa [#allocation3], 1 }

</bundles_post_ra>
